<compile_context>
chip_gen: v7x
topology: tpu7x:2x2x1
jax: 0.10.0
libtpu: 0.0.40
codegen_flags: <defaults>
</compile_context>

<pallas_src>
import jax
import jax.numpy as jnp
from jax.experimental import pallas as pl
from jax.experimental.pallas import tpu as pltpu


def _round_up(a, m):
    return ((a + m - 1) // m) * m


def _pick_tm(f_out, max_tile=256):
    """Sublane-dim tile for F_out: multiple of 8 dividing F_out, <= max_tile."""
    if f_out % 8 != 0:
        return f_out  # full-dim block is always legal
    t = min((max_tile // 8) * 8, f_out)
    while f_out % t != 0:
        t -= 8
    return t


def _pick_tn(n_padded, max_tile=512):
    """Lane-dim tile: multiple of 128 dividing the (padded) fused B*T axis."""
    t = min(max_tile, n_padded)
    while n_padded % t != 0:
        t -= 128
    return t


def module_layer_kernel(x_ref, w_ref, b_ref, o_ref):
    # w_ref: (tm, F_in)   weight tile (full K)
    # x_ref: (F_in, tn)   fused batch*time lane tile
    # b_ref: (tm, 1)      bias tile
    # o_ref: (tm, tn)
    y = jnp.dot(w_ref[...], x_ref[...], preferred_element_type=jnp.float32)
    o_ref[...] = (y + b_ref[...].astype(jnp.float32)).astype(o_ref.dtype)


def module_layer_forward(x, w, b):
    """Applies a Linear layer independently per time step (time on last axis).

    Args:
      x: [B, F_in, T]
      w: [F_out, F_in]
      b: [F_out]
    Returns:
      [B, F_out, T]  (same dtype as x)
    """
    B, F_in, T = x.shape
    F_out = w.shape[0]
    N = B * T

    # --- wrapper-side layout plumbing: fuse batch & time into lanes ---------
    # X2[i, b*T + t] = x[b, i, t]
    x2 = jnp.transpose(x, (1, 0, 2)).reshape(F_in, N)

    # Pad the lane axis to a multiple of 128 so all loads/stores are lane-dense.
    Np = _round_up(N, 128)
    if Np != N:
        x2 = jnp.pad(x2, ((0, 0), (0, Np - N)))

    b2d = b.reshape(F_out, 1)

    tm = _pick_tm(F_out)
    tn = _pick_tn(Np)
    grid_m = F_out // tm if F_out % tm == 0 else 1
    grid_n = Np // tn

    y2 = pl.pallas_call(
        module_layer_kernel,
        out_shape=jax.ShapeDtypeStruct((F_out, Np), x.dtype),
        grid_spec=pltpu.PrefetchScalarGridSpec(
            num_scalar_prefetch=0,
            grid=(grid_m, grid_n),
            in_specs=[
                # activations: full K, lane tile j
                pl.BlockSpec((F_in, tn), lambda i, j: (0, j)),
                # weights: F_out tile i, full K (resident across j)
                pl.BlockSpec((tm, F_in), lambda i, j: (i, 0)),
                # bias: F_out tile i
                pl.BlockSpec((tm, 1), lambda i, j: (i, 0)),
            ],
            out_specs=pl.BlockSpec((tm, tn), lambda i, j: (i, j)),
        ),
        compiler_params=pltpu.CompilerParams(
            dimension_semantics=("parallel", "parallel"),
        ),
    )(x2, w, b2d)

    # --- unfuse: [F_out, Np] -> [B, F_out, T] -------------------------------
    y2 = y2[:, :N]
    return jnp.transpose(y2.reshape(F_out, B, T), (1, 0, 2))


if __name__ == "__main__":
    # Small shapes consistent with the module: batch=2, features=32, T=8 steps.
    B, F_in, F_out, T = 2, 32, 32, 8

    key = jax.random.PRNGKey(0)
    kx, kw, kb = jax.random.split(key, 3)

    x = jax.random.normal(kx, (B, F_in, T), dtype=jnp.float32)
    # Deterministic parameter init (mimics nn.Linear's uniform fan-in scaling).
    bound = 1.0 / (F_in ** 0.5)
    w = jax.random.uniform(kw, (F_out, F_in), jnp.float32, -bound, bound)
    b = jax.random.uniform(kb, (F_out,), jnp.float32, -bound, bound)

    y = module_layer_forward(x, w, b)
    y = jax.block_until_ready(y)

    # Pure-JAX reference: per-time-step Linear, stacked on last axis.
    y_ref = jnp.einsum("oi,bit->bot", w, x) + b[None, :, None]
    assert y.shape == (B, F_out, T)
    assert jnp.allclose(y, y_ref, atol=1e-5, rtol=1e-5)

    print("KERNEL_OK")
</pallas_src>

<mosaic_0001>
module attributes {stable_mosaic.version = 11 : i64} {
  func.func @module_layer_kernel(%arg0: i32, %arg1: i32, %arg2: memref<32x128xf32, #tpu.memory_space<vmem>>, %arg3: memref<32x32xf32, #tpu.memory_space<vmem>>, %arg4: memref<32x1xf32, #tpu.memory_space<vmem>>, %arg5: memref<32x128xf32, #tpu.memory_space<vmem>>) attributes {dimension_semantics = [#tpu.dimension_semantics<parallel>, #tpu.dimension_semantics<parallel>], iteration_bounds = array<i64: 1, 1>, scalar_prefetch = 0 : i64, scratch_operands = 0 : i64, tpu.core_type = #tpu.core_type<tc>, window_params = [{transform_indices = @transform_0, window_bounds = array<i64: 32, 128>}, {transform_indices = @transform_1, window_bounds = array<i64: 32, 32>}, {transform_indices = @transform_2, window_bounds = array<i64: 32, 1>}, {transform_indices = @transform_3, window_bounds = array<i64: 32, 128>}]} {
    %c0 = arith.constant 0 : index
    %c0_0 = arith.constant 0 : index
    %0 = vector.load %arg3[%c0, %c0_0] : memref<32x32xf32, #tpu.memory_space<vmem>>, vector<32x32xf32>
    %c0_1 = arith.constant 0 : index
    %c0_2 = arith.constant 0 : index
    %1 = vector.load %arg2[%c0_1, %c0_2] : memref<32x128xf32, #tpu.memory_space<vmem>>, vector<32x128xf32>
    %cst = arith.constant dense<0.000000e+00> : vector<32x128xf32>
    %2 = tpu.matmul %0, %1, %cst {dimension_numbers = #tpu.dot_dimension_numbers<[1], [0], [0], [1], [0, 0, 1, 1], [], []>} : vector<32x32xf32>, vector<32x128xf32>, vector<32x128xf32> -> vector<32x128xf32>
    %c0_3 = arith.constant 0 : index
    %c0_4 = arith.constant 0 : index
    %3 = vector.load %arg4[%c0_3, %c0_4] : memref<32x1xf32, #tpu.memory_space<vmem>>, vector<32x1xf32>
    %4 = vector.broadcast %3 : vector<32x1xf32> to vector<32x128xf32>
    %5 = arith.addf %2, %4 : vector<32x128xf32>
    %c0_5 = arith.constant 0 : index
    %c0_6 = arith.constant 0 : index
    %6 = vector.load %arg5[%c0_5, %c0_6] : memref<32x128xf32, #tpu.memory_space<vmem>>, vector<32x128xf32>
    tpu.vector_store %arg5[%c0_5, %c0_6], %5 {strides = array<i32>} : memref<32x128xf32, #tpu.memory_space<vmem>>, vector<32x128xf32>,
    return
  }
  func.func @transform_0(%arg0: i32, %arg1: i32) -> (i32, i32) {
    %c0_i32 = arith.constant 0 : i32
    %c0_i32_0 = arith.constant 0 : i32
    return %c0_i32, %arg1 : i32, i32
  }
  func.func @transform_1(%arg0: i32, %arg1: i32) -> (i32, i32) {
    %c0_i32 = arith.constant 0 : i32
    %c0_i32_0 = arith.constant 0 : i32
    return %arg0, %c0_i32 : i32, i32
  }
  func.func @transform_2(%arg0: i32, %arg1: i32) -> (i32, i32) {
    %c0_i32 = arith.constant 0 : i32
    %c0_i32_0 = arith.constant 0 : i32
    return %arg0, %c0_i32 : i32, i32
  }
  func.func @transform_3(%arg0: i32, %arg1: i32) -> (i32, i32) {
    %c0_i32 = arith.constant 0 : i32
    return %arg0, %arg1 : i32, i32
  }
}

</mosaic_0001>

<bundles_post_ra>
// kernel: tpu_custom_call.1
= control target key start
LH: loop header
LB: loop body
LE: loop exit
PB: predicated region body
PF: predicated region fallthrough
CT: control target
= control target key end

     0   :  { %8 = vsyncpa [#allocation3], 0  ;;  %s356_s0 = inlined_call_operand.vmem [shape: f32[32,128], index: 0, kind: input, shape index: {}]   ;;  %s357_s1 = inlined_call_operand.hbm [shape: f32[32,32], index: 1, kind: input, shape index: {}]   ;;  %s358_s2 = inlined_call_operand.vmem [shape: f32[32,1], index: 2, kind: input, shape index: {}]   ;;  %s359_s3 = inlined_call_operand.hbm [shape: f32[32,128], index: 3, kind: output, shape index: {}]  }
   0x1   :  { %9 = vsyncpa [#allocation4], 0  ;;  %s273_s12 = smov [#allocation2]   ;;  %s225_s16 = scalar_lea.hbm %s357_s1, 512 }
   0x2   :  { %s17_s13 = sshll.u32 %s273_s12, 4  ;;  %p226_p0 = scmp.ne.s32.totalorder %s357_s1, %s225_s16  ;;  %s18_s13 = int_to_ptr.vmem [resolvable:$true] %s17_s13 }
   0x3   :  { %p229_p1 = scmp.lt.u32.totalorder %s225_s16, %s357_s1 }
   0x5   :  { %p231_p2 = pnand %p229_p1, %p226_p0 }
   0x7   :  { %234 = shalt.err (!%p231_p2)
}
   0x8   :  { %s235_s21 = scalar_lea.vmem %s18_s13, 512  ;;  %p240_p4 = scmp.lt.s32.totalorder %s18_s13, %s18_s13 }
   0x9   :  { %p236_p3 = scmp.ne.s32.totalorder %s18_s13, %s235_s21  ;;  %p241_p5 = scmp.lt.s32.totalorder %s235_s21, %s235_s21 }
   0xb   :  { %p242_p6 = por %p241_p5, %p240_p4 }
   0xd   :  { %p243_p7 = pnand %p242_p6, %p236_p3 }
   0xf   :  { %246 = shalt.err (!%p243_p7)
}
  0x10   :  { %s274_s22 = smov 128   ;;  %s275_s23 = smov 8  }
  0x11   :  { %23 = dma.hbm_to_vmem [thread:$0]  %s357_s1, 512, %s18_s13, [#allocation3], %s274_s22, %s274_s22, %s275_s23  }
  0x12   :  { %269 = dma.done.wait [#allocation3], 512  }
  0x13   :  { %270 = vsyncadd [#allocation3], 4294966784  ;;  %v276_v0 = vmov 0   ;;  %vm61_vm0 = vcmask 261120   ;;  %v33_v1 = vld [vmem:[%s356_s0] sm:$0xff]  ;;  %v34_v2 = vld [vmem:[%s356_s0 + $0x8] sm:$0xff] }
  0x14   :  { %224 = vset.pattern.permute.xlu1 %v276_v0  ;;  %223 = vset.pattern.permute.xlu0 %v276_v0  ;;  %v35_v3 = vld [vmem:[%s356_s0 + $0x10] sm:$0xff]  ;;  %v206_v4 = vpack.c.bf16 %v34_v2, %v33_v1  ;;  %v36_v5 = vld [vmem:[%s356_s0 + $0x18] sm:$0xff]  ;;  %v29_v6 = vld [vmem:[#allocation2] sm:$0xff]  ;;  %s277_s13 = smov [#allocation5]  }
  0x15   :  { %v31_v7 = vld [vmem:[#allocation2 + $0x10] sm:$0xff]  ;;  %v210_v8 = vpack.c.bf16 %v36_v5, %v35_v3  ;;  %200 = vmatprep.mubr.msk.f32.mxu0 %vm61_vm0, %v29_v6  ;;  %v37_v10 = vld [vmem:[%s358_s2] sm:$0xff]  ;;  %v40_v11 = vld [vmem:[%s358_s2 + $0x18] sm:$0xff]  ;;  %s168_s14 = sshll.u32 %s277_s13, 4  ;;  %s169_s14 = int_to_ptr.vmem [resolvable:$true] %s168_s14 }
  0x16   :  { %203 = vmatprep.mubr.msk.f32.mxu1 %vm61_vm0, %v31_v7  ;;  %207 = vmatprep.subr.bf16.mxu0 %v206_v4  ;;  %v39_v9 = vld [vmem:[%s358_s2 + $0x10] sm:$0xff]  ;;  %v38_v12 = vld [vmem:[%s358_s2 + $0x8] sm:$0xff]  ;;  %v32_v14 = vld [vmem:[#allocation2 + $0x18] sm:$0xff]  ;;  %s247_s2 = scalar_lea.vmem %s169_s14, 512  ;;  %p252_p9 = scmp.lt.s32.totalorder %s169_s14, %s169_s14 }
  0x17   :  { %214 = vmatprep.subr.bf16.mxu1 %v206_v4  ;;  %209 = vmatpush3.bf16.msra.mxu0 %v206_v4  ;;  %v30_v13 = vld [vmem:[#allocation2 + $0x8] sm:$0xff]  ;;  %p248_p8 = scmp.ne.s32.totalorder %s169_s14, %s247_s2  ;;  %p253_p10 = scmp.lt.s32.totalorder %s247_s2, %s247_s2 }
  0x18   :  { %216 = vmatpush3.bf16.msra.mxu1 %v206_v4  ;;  %211 = vmatprep.subr.bf16.mxu0 %v210_v8 }
  0x19   :  { %215 = vmatprep.subr.bf16.mxu1 %v210_v8  ;;  %53 = vperm.xlu1 %224, %v39_v9   ;;  %p254_p11 = por %p253_p10, %p252_p9 }
  0x1a   :  { %43 = vperm.xlu0 %223, %v37_v10  }
  0x1b   :  { %213 = vmatpush3.bf16.msra.mxu0 %v210_v8  ;;  %p255_p12 = pnand %p254_p11, %p248_p8 }
  0x1c   :  { %217 = vmatpush3.bf16.msra.mxu1 %v210_v8 }
  0x1d   :  { %58 = vperm.xlu1 %224, %v40_v11  }
  0x1e   :  { %48 = vperm.xlu0 %223, %v38_v12   ;;  %201 = vmatmul.mubr.msk.f32.vlgmr.msra.gmra.mrb[0].mxu0 %vm61_vm0, %v30_v13 }
  0x1f   :  { %204 = vmatmul.mubr.msk.f32.vlgmr.msra.gmra.mrb[0].mxu1 %vm61_vm0, %v32_v14 }
  0x98   :  { %v54_v15 = vpop.permute.xlu1 %53 }
  0x99   :  { %v44_v16 = vpop.permute.xlu0 %43 }
  0x9c   :  { %v59_v17 = vpop.permute.xlu1 %58 }
  0x9d   :  { %v49_v18 = vpop.permute.xlu0 %48 }
  0xf1   :  { %v202_v19 = vpop.f32.mrb[0].mxu0 }
  0xf2   :  { %v205_v20 = vpop.f32.mrb[0].mxu1  ;;  %v146_v21 = vadd.f32 %v202_v19, %v49_v18  ;;  %v140_v23 = vpop.f32.mrb[1].mxu0 }
  0xf3   :  { %v156_v22 = vadd.f32 %v205_v20, %v59_v17  ;;  %v150_v24 = vpop.f32.mrb[1].mxu1  ;;  %v141_v25 = vadd.f32 %v140_v23, %v44_v16 }
  0xf4   :  { %v151_v26 = vadd.f32 %v150_v24, %v54_v15  ;;  %160 = vst [vmem:[#allocation5 + $0x8] sm:$0xff] %v146_v21 }
  0xf5   :  { %162 = vst [vmem:[#allocation5 + $0x18] sm:$0xff] %v156_v22  ;;  %159 = vst [vmem:[#allocation5] sm:$0xff] %v141_v25 }
  0xf6   :  { %161 = vst [vmem:[#allocation5 + $0x10] sm:$0xff] %v151_v26 }
  0xf7   :  { %258 = shalt.err (!%p255_p12)
}
  0xf8   :  { %s259_s17 = scalar_lea.hbm %s359_s3, 512 }
  0xf9   :  { %p260_p13 = scmp.ne.s32.totalorder %s359_s3, %s259_s17  ;;  %p263_p0 = scmp.lt.u32.totalorder %s259_s17, %s359_s3 }
  0xfb   :  { %p265_p1 = pnand %p263_p0, %p260_p13 }
  0xfd   :  { %268 = shalt.err (!%p265_p1)
}
  0xfe   :  { %174 = dma.vmem_to_hbm [thread:$0]  %s169_s14, 512, %s359_s3, [#allocation4], %s274_s22, %s274_s22, %s275_s23  }
  0xff   :  { %271 = dma.done.wait [#allocation4], 512  }
 0x100   :  { %272 = vsyncadd [#allocation4], 4294966784 }
 0x101   :  { %178 = vsyncpa [#allocation3], 1 }
 0x102   :  { %179 = vsyncpa [#allocation4], 1 }

</bundles_post_ra>
